<compile_context>
chip_gen: v6e
topology: v6e:2x2x1
jax: 0.10.0
libtpu: 0.0.40
codegen_flags: <defaults>
</compile_context>

<pallas_src>
import jax
import jax.numpy as jnp
from jax import lax
from jax.experimental import pallas as pl
from jax.experimental.pallas import tpu as pltpu

# ------------------------- problem sizes (module-consistent) -------------------------
B, C, H, W = 2, 64, 16, 16      # input [B, C, H, W]
RED = 16                        # CALayer default reduction
CR = C // RED                   # squeezed channel count (4)
HW = H * W                      # 256 -> lane-dense (2 x 128 lanes)


# ----------------------------- fused channel-attention kernel ------------------------
def ca_kernel(x_ref, w1_ref, b1_ref, w2_ref, b2_ref, o_ref):
    x = x_ref[...]                                                    # [B, C, HW] f32
    # AdaptiveAvgPool2d(1): lane-axis (HW) reduction per (batch, channel).
    # Assemble the pooled vectors as columns of y[C, B] so both batch elements
    # go through the squeeze-excite matmuls together (one MXU op per layer).
    cols = [jnp.sum(x[b], axis=1, keepdims=True) for b in range(B)]   # B x [C, 1]
    y = jnp.concatenate(cols, axis=1) * (1.0 / HW)                    # [C, B]
    # Conv2d(C, C//r, 1, bias=True) + ReLU   (1x1 conv == channel matmul)
    h = jnp.dot(w1_ref[...], y, preferred_element_type=jnp.float32) + b1_ref[...]
    h = jnp.maximum(h, 0.0)                                           # [CR, B]
    # Conv2d(C//r, C, 1, bias=True) + Sigmoid
    a = jnp.dot(w2_ref[...], h, preferred_element_type=jnp.float32) + b2_ref[...]
    a = jax.nn.sigmoid(a)                                             # [C, B]
    # x * y : broadcast the per-channel attention over the lane (spatial) axis.
    for b in range(B):                                                # static unroll
        o_ref[b] = x[b] * a[:, b:b + 1]


def ca_layer_forward(x, params):
    """x: [B, C, H, W] float32 -> [B, C, H, W]  (CALayer forward)."""
    x3 = x.reshape(B, C, HW)                     # free, contiguous reshape
    out = pl.pallas_call(
        ca_kernel,
        out_shape=jax.ShapeDtypeStruct((B, C, HW), jnp.float32),
        grid_spec=pltpu.PrefetchScalarGridSpec(
            num_scalar_prefetch=0,
            grid=(1,),                                               # single step
            in_specs=[
                pl.BlockSpec((B, C, HW), lambda i: (0, 0, 0)),       # x  (128 KiB)
                pl.BlockSpec((CR, C), lambda i: (0, 0)),             # w1 [C//r, C]
                pl.BlockSpec((CR, 1), lambda i: (0, 0)),             # b1 [C//r, 1]
                pl.BlockSpec((C, CR), lambda i: (0, 0)),             # w2 [C, C//r]
                pl.BlockSpec((C, 1), lambda i: (0, 0)),              # b2 [C, 1]
            ],
            out_specs=pl.BlockSpec((B, C, HW), lambda i: (0, 0, 0)),
        ),
        compiler_params=pltpu.CompilerParams(
            dimension_semantics=("arbitrary",)),                     # 1 step: no megacore benefit
    )(x3, params["w1"], params["b1"], params["w2"], params["b2"])
    return out.reshape(B, C, H, W)


# ----------------------------- deterministic parameter init --------------------------
def init_params(key):
    k = jax.random.split(key, 4)
    w1 = jax.random.normal(k[0], (CR, C), jnp.float32) * (1.0 / jnp.sqrt(C))
    b1 = 0.1 * jax.random.normal(k[1], (CR,), jnp.float32)
    w2 = jax.random.normal(k[2], (C, CR), jnp.float32) * (1.0 / jnp.sqrt(CR))
    b2 = 0.1 * jax.random.normal(k[3], (C,), jnp.float32)
    return dict(
        w1=w1,                          # Conv2d(C, C//r, 1) weight, squeezed to [C//r, C]
        b1=b1.reshape(CR, 1),
        w2=w2,                          # Conv2d(C//r, C, 1) weight, squeezed to [C, C//r]
        b2=b2.reshape(C, 1),
    )


# --------------------------------- pure-JAX reference --------------------------------
def ca_reference(x, params):
    y = jnp.mean(x, axis=(2, 3))                                           # [B, C]
    h = jax.nn.relu(
        jnp.dot(y, params["w1"].T, precision=lax.Precision.HIGHEST)
        + params["b1"].reshape(1, CR))
    a = jax.nn.sigmoid(
        jnp.dot(h, params["w2"].T, precision=lax.Precision.HIGHEST)
        + params["b2"].reshape(1, C))
    return x * a[:, :, None, None]


if __name__ == "__main__":
    key = jax.random.PRNGKey(0)
    kx, kp = jax.random.split(key)
    x = jax.random.normal(kx, (B, C, H, W), jnp.float32)
    params = init_params(kp)

    out = ca_layer_forward(x, params)
    out = jax.block_until_ready(out)

    ref = ca_reference(x, params)
    assert out.shape == (B, C, H, W)
    # f32 end-to-end; slightly relaxed vs 1e-4 to be robust to the MXU's f32
    # pass scheme differing across chip generations.
    assert jnp.allclose(out, ref, atol=2e-4, rtol=2e-4)
    print("KERNEL_OK")
</pallas_src>

<mosaic_0001>
module attributes {stable_mosaic.version = 11 : i64} {
  func.func @ca_kernel(%arg0: i32, %arg1: memref<2x64x256xf32, #tpu.memory_space<vmem>>, %arg2: memref<4x64xf32, #tpu.memory_space<vmem>>, %arg3: memref<4x1xf32, #tpu.memory_space<vmem>>, %arg4: memref<64x4xf32, #tpu.memory_space<vmem>>, %arg5: memref<64x1xf32, #tpu.memory_space<vmem>>, %arg6: memref<2x64x256xf32, #tpu.memory_space<vmem>>) attributes {dimension_semantics = [#tpu.dimension_semantics<arbitrary>], iteration_bounds = array<i64: 1>, scalar_prefetch = 0 : i64, scratch_operands = 0 : i64, tpu.core_type = #tpu.core_type<tc>, window_params = [{pipeline_mode = #tpu.pipeline_mode<synchronous>, transform_indices = @transform_0, window_bounds = array<i64: 2, 64, 256>}, {pipeline_mode = #tpu.pipeline_mode<synchronous>, transform_indices = @transform_1, window_bounds = array<i64: 4, 64>}, {pipeline_mode = #tpu.pipeline_mode<synchronous>, transform_indices = @transform_2, window_bounds = array<i64: 4, 1>}, {pipeline_mode = #tpu.pipeline_mode<synchronous>, transform_indices = @transform_3, window_bounds = array<i64: 64, 4>}, {pipeline_mode = #tpu.pipeline_mode<synchronous>, transform_indices = @transform_4, window_bounds = array<i64: 64, 1>}, {pipeline_mode = #tpu.pipeline_mode<synchronous>, transform_indices = @transform_5, window_bounds = array<i64: 2, 64, 256>}]} {
    %c0 = arith.constant 0 : index
    %c0_0 = arith.constant 0 : index
    %c0_1 = arith.constant 0 : index
    %0 = vector.load %arg1[%c0, %c0_0, %c0_1] : memref<2x64x256xf32, #tpu.memory_space<vmem>>, vector<2x64x256xf32>
    %1 = vector.extract_strided_slice %0 {offsets = [0, 0, 0], sizes = [1, 64, 256], strides = [1, 1, 1]} : vector<2x64x256xf32> to vector<1x64x256xf32>
    %2 = vector.shape_cast %1 : vector<1x64x256xf32> to vector<64x256xf32>
    %cst = arith.constant dense<0.000000e+00> : vector<64xf32>
    %3 = vector.multi_reduction <add>, %2, %cst [1] : vector<64x256xf32> to vector<64xf32>
    %4 = vector.shape_cast %3 : vector<64xf32> to vector<64x1xf32>
    %5 = vector.extract_strided_slice %0 {offsets = [1, 0, 0], sizes = [1, 64, 256], strides = [1, 1, 1]} : vector<2x64x256xf32> to vector<1x64x256xf32>
    %6 = vector.shape_cast %5 : vector<1x64x256xf32> to vector<64x256xf32>
    %cst_2 = arith.constant dense<0.000000e+00> : vector<64xf32>
    %7 = vector.multi_reduction <add>, %6, %cst_2 [1] : vector<64x256xf32> to vector<64xf32>
    %8 = vector.shape_cast %7 : vector<64xf32> to vector<64x1xf32>
    %9 = tpu.concatenate %4, %8 in 1 : vector<64x1xf32>, vector<64x1xf32> -> vector<64x2xf32>
    %cst_3 = arith.constant 3.906250e-03 : f32
    %10 = vector.broadcast %cst_3 : f32 to vector<64x2xf32>
    %11 = arith.mulf %9, %10 : vector<64x2xf32>
    %c0_4 = arith.constant 0 : index
    %c0_5 = arith.constant 0 : index
    %12 = vector.load %arg2[%c0_4, %c0_5] : memref<4x64xf32, #tpu.memory_space<vmem>>, vector<4x64xf32>
    %cst_6 = arith.constant dense<0.000000e+00> : vector<4x2xf32>
    %13 = tpu.matmul %12, %11, %cst_6 {dimension_numbers = #tpu.dot_dimension_numbers<[1], [0], [0], [1], [0, 0, 1, 1], [], []>} : vector<4x64xf32>, vector<64x2xf32>, vector<4x2xf32> -> vector<4x2xf32>
    %c0_7 = arith.constant 0 : index
    %c0_8 = arith.constant 0 : index
    %14 = vector.load %arg3[%c0_7, %c0_8] : memref<4x1xf32, #tpu.memory_space<vmem>>, vector<4x1xf32>
    %15 = vector.broadcast %14 : vector<4x1xf32> to vector<4x2xf32>
    %16 = arith.addf %13, %15 : vector<4x2xf32>
    %cst_9 = arith.constant 0.000000e+00 : f32
    %17 = vector.broadcast %cst_9 : f32 to vector<4x2xf32>
    %18 = arith.maximumf %16, %17 : vector<4x2xf32>
    %c0_10 = arith.constant 0 : index
    %c0_11 = arith.constant 0 : index
    %19 = vector.load %arg4[%c0_10, %c0_11] : memref<64x4xf32, #tpu.memory_space<vmem>>, vector<64x4xf32>
    %cst_12 = arith.constant dense<0.000000e+00> : vector<64x2xf32>
    %20 = tpu.matmul %19, %18, %cst_12 {dimension_numbers = #tpu.dot_dimension_numbers<[1], [0], [0], [1], [0, 0, 1, 1], [], []>} : vector<64x4xf32>, vector<4x2xf32>, vector<64x2xf32> -> vector<64x2xf32>
    %c0_13 = arith.constant 0 : index
    %c0_14 = arith.constant 0 : index
    %21 = vector.load %arg5[%c0_13, %c0_14] : memref<64x1xf32, #tpu.memory_space<vmem>>, vector<64x1xf32>
    %22 = vector.broadcast %21 : vector<64x1xf32> to vector<64x2xf32>
    %23 = arith.addf %20, %22 : vector<64x2xf32>
    %24 = arith.negf %23 : vector<64x2xf32>
    %25 = math.exp %24 : vector<64x2xf32>
    %cst_15 = arith.constant 1.000000e+00 : f32
    %26 = vector.broadcast %cst_15 : f32 to vector<64x2xf32>
    %27 = arith.addf %26, %25 : vector<64x2xf32>
    %28 = arith.divf %26, %27 : vector<64x2xf32>
    %29 = vector.extract_strided_slice %0 {offsets = [0, 0, 0], sizes = [1, 64, 256], strides = [1, 1, 1]} : vector<2x64x256xf32> to vector<1x64x256xf32>
    %30 = vector.shape_cast %29 : vector<1x64x256xf32> to vector<64x256xf32>
    %31 = vector.extract_strided_slice %28 {offsets = [0, 0], sizes = [64, 1], strides = [1, 1]} : vector<64x2xf32> to vector<64x1xf32>
    %32 = vector.broadcast %31 : vector<64x1xf32> to vector<64x256xf32>
    %33 = arith.mulf %30, %32 : vector<64x256xf32>
    %c0_16 = arith.constant 0 : index
    %c0_17 = arith.constant 0 : index
    %c0_18 = arith.constant 0 : index
    %34 = vector.load %arg6[%c0_16, %c0_17, %c0_18] : memref<2x64x256xf32, #tpu.memory_space<vmem>>, vector<1x64x256xf32>
    %35 = vector.shape_cast %34 : vector<1x64x256xf32> to vector<64x256xf32>
    %36 = vector.shape_cast %33 : vector<64x256xf32> to vector<1x64x256xf32>
    tpu.vector_store %arg6[%c0_16, %c0_17, %c0_18], %36 {strides = array<i32>} : memref<2x64x256xf32, #tpu.memory_space<vmem>>, vector<1x64x256xf32>,
    %37 = vector.extract_strided_slice %0 {offsets = [1, 0, 0], sizes = [1, 64, 256], strides = [1, 1, 1]} : vector<2x64x256xf32> to vector<1x64x256xf32>
    %38 = vector.shape_cast %37 : vector<1x64x256xf32> to vector<64x256xf32>
    %39 = vector.extract_strided_slice %28 {offsets = [0, 1], sizes = [64, 1], strides = [1, 1]} : vector<64x2xf32> to vector<64x1xf32>
    %40 = vector.broadcast %39 : vector<64x1xf32> to vector<64x256xf32>
    %41 = arith.mulf %38, %40 : vector<64x256xf32>
    %c1 = arith.constant 1 : index
    %c0_19 = arith.constant 0 : index
    %c0_20 = arith.constant 0 : index
    %42 = vector.load %arg6[%c1, %c0_19, %c0_20] : memref<2x64x256xf32, #tpu.memory_space<vmem>>, vector<1x64x256xf32>
    %43 = vector.shape_cast %42 : vector<1x64x256xf32> to vector<64x256xf32>
    %44 = vector.shape_cast %41 : vector<64x256xf32> to vector<1x64x256xf32>
    tpu.vector_store %arg6[%c1, %c0_19, %c0_20], %44 {strides = array<i32>} : memref<2x64x256xf32, #tpu.memory_space<vmem>>, vector<1x64x256xf32>,
    return
  }
  func.func @transform_0(%arg0: i32) -> (i32, i32, i32) {
    %c0_i32 = arith.constant 0 : i32
    %c0_i32_0 = arith.constant 0 : i32
    %c0_i32_1 = arith.constant 0 : i32
    %c0_i32_2 = arith.constant 0 : i32
    return %c0_i32, %c0_i32_0, %c0_i32_1 : i32, i32, i32
  }
  func.func @transform_1(%arg0: i32) -> (i32, i32) {
    %c0_i32 = arith.constant 0 : i32
    %c0_i32_0 = arith.constant 0 : i32
    %c0_i32_1 = arith.constant 0 : i32
    return %c0_i32, %c0_i32_0 : i32, i32
  }
  func.func @transform_2(%arg0: i32) -> (i32, i32) {
    %c0_i32 = arith.constant 0 : i32
    %c0_i32_0 = arith.constant 0 : i32
    %c0_i32_1 = arith.constant 0 : i32
    return %c0_i32, %c0_i32_0 : i32, i32
  }
  func.func @transform_3(%arg0: i32) -> (i32, i32) {
    %c0_i32 = arith.constant 0 : i32
    %c0_i32_0 = arith.constant 0 : i32
    %c0_i32_1 = arith.constant 0 : i32
    return %c0_i32, %c0_i32_0 : i32, i32
  }
  func.func @transform_4(%arg0: i32) -> (i32, i32) {
    %c0_i32 = arith.constant 0 : i32
    %c0_i32_0 = arith.constant 0 : i32
    %c0_i32_1 = arith.constant 0 : i32
    return %c0_i32, %c0_i32_0 : i32, i32
  }
  func.func @transform_5(%arg0: i32) -> (i32, i32, i32) {
    %c0_i32 = arith.constant 0 : i32
    %c0_i32_0 = arith.constant 0 : i32
    %c0_i32_1 = arith.constant 0 : i32
    %c0_i32_2 = arith.constant 0 : i32
    return %c0_i32, %c0_i32_0, %c0_i32_1 : i32, i32, i32
  }
}

</mosaic_0001>

<bundles_post_ra>
// kernel: tpu_custom_call.1
= control target key start
LH: loop header
LB: loop body
LE: loop exit
PB: predicated region body
PF: predicated region fallthrough
CT: control target
= control target key end

     0   :  { %10 = vsyncpa [#allocation3], 0  ;;  %s1037_s0 = inlined_call_operand.hbm [shape: f32[2,64,256], index: 0, kind: input, shape index: {}]   ;;  %s1038_s1 = inlined_call_operand.vmem [shape: f32[4,64], index: 1, kind: input, shape index: {}]   ;;  %s1039_s2 = inlined_call_operand.vmem [shape: f32[4,1], index: 2, kind: input, shape index: {}]   ;;  %s1040_s3 = inlined_call_operand.vmem [shape: f32[64,4], index: 3, kind: input, shape index: {}]   ;;  %s1041_s4 = inlined_call_operand.vmem [shape: f32[64,1], index: 4, kind: input, shape index: {}]   ;;  %s1042_s5 = inlined_call_operand.hbm [shape: f32[2,64,256], index: 5, kind: output, shape index: {}]  }
   0x1   :  { %11 = vsyncpa [#allocation4], 0  ;;  %s773_s18 = smov [#allocation2]  }
   0x2   :  { %s17_s19 = sshll.u32 %s773_s18, 4  ;;  %s18_s19 = int_to_ptr.vmem [resolvable:$true] %s17_s19 }
   0x3   :  { %s737_s20 = scalar_lea.vmem %s18_s19, 4096  ;;  %p742_p1 = scmp.lt.s32.totalorder %s18_s19, %s18_s19 }
   0x4   :  { %p738_p0 = scmp.ne.s32.totalorder %s18_s19, %s737_s20  ;;  %p743_p2 = scmp.lt.s32.totalorder %s737_s20, %s737_s20 }
   0x6   :  { %p744_p3 = por %p743_p2, %p742_p1 }
   0x8   :  { %p745_p4 = pnand %p744_p3, %p738_p0 }
   0xa   :  { %748 = shalt.err (!%p745_p4)
}
   0xb   :  { %s774_s21 = smov 256   ;;  %s775_s22 = smov 16  }
   0xc   :  { %23 = dma.hbm_to_vmem [thread:$0]  %s1037_s0, 4096, %s18_s19, [#allocation3], %s774_s21, %s774_s21, %s775_s22  }
   0xd   :  { %769 = dma.done.wait [#allocation3], 4096  }
   0xe   :  { %770 = vsyncadd [#allocation3], 4294963200  ;;  %v817_v0 = vld [vmem:[#allocation2 + $0x70] sm:$0xff]  ;;  %v819_v1 = vld [vmem:[#allocation2 + $0x78] sm:$0xff]  ;;  %v776_v38 = vmov 0.0   ;;  %vm777_vm0 = vmmov 0  }
   0xf   :  { %v821_v2 = vld [vmem:[#allocation2 + $0x60] sm:$0xff]  ;;  %v88_v3 = vadd.f32 %v819_v1, %v817_v0  ;;  %v825_v4 = vld [vmem:[#allocation2 + $0x68] sm:$0xff]  ;;  %v827_v5 = vld [vmem:[#allocation2 + $0xf0] sm:$0xff]  ;;  %642 = vmatprep.subr.mxu0 %v776_v38  ;;  %658 = vmatprep.mubr.msk.f32.mxu0 %vm777_vm0, %v776_v38  ;;  %v778_v49 = vmov 0   ;;  %vm115_vm1 = vcmask 7168   ;;  %vm139_vm2 = vcmask 523264  }
  0x10   :  { %v829_v6 = vld [vmem:[#allocation2 + $0xf8] sm:$0xff]  ;;  %v85_v7 = vadd.f32 %v825_v4, %v821_v2  ;;  %v833_v8 = vld [vmem:[#allocation2 + $0xe0] sm:$0xff]  ;;  %v835_v9 = vld [vmem:[#allocation2 + $0xe8] sm:$0xff]  ;;  %683 = vset.pattern.permute.xlu0 %v778_v49  ;;  %684 = vset.pattern.permute.xlu1 %v778_v49  ;;  %vm270_vm3 = vcmask 31744   ;;  %vm295_vm4 = vcmask 1043456  }
  0x11   :  { %89 = vadd.xlane.f32.xlu0 %v88_v3  ;;  %v112_v10 = vadd.f32 %v829_v6, %v827_v5  ;;  %v109_v11 = vadd.f32 %v835_v9, %v833_v8  ;;  %v841_v12 = vld [vmem:[#allocation2 + $0x50] sm:$0xff]  ;;  %v843_v13 = vld [vmem:[#allocation2 + $0x58] sm:$0xff]  ;;  %v853_v18 = vld [vmem:[#allocation2 + $0x40] sm:$0xff] }
  0x12   :  { %86 = vadd.xlane.f32.xlu1 %v85_v7  ;;  %v845_v14 = vld [vmem:[#allocation2 + $0xd0] sm:$0xff]  ;;  %v847_v15 = vld [vmem:[#allocation2 + $0xd8] sm:$0xff]  ;;  %v82_v16 = vadd.f32 %v843_v13, %v841_v12  ;;  %v855_v19 = vld [vmem:[#allocation2 + $0x48] sm:$0xff] }
  0x13   :  { %v106_v17 = vadd.f32 %v847_v15, %v845_v14  ;;  %v857_v20 = vld [vmem:[#allocation2 + $0xc0] sm:$0xff]  ;;  %v859_v21 = vld [vmem:[#allocation2 + $0xc8] sm:$0xff]  ;;  %v79_v22 = vadd.f32 %v855_v19, %v853_v18  ;;  %v865_v24 = vld [vmem:[#allocation2 + $0x30] sm:$0xff] }
  0x14   :  { %v103_v23 = vadd.f32 %v859_v21, %v857_v20  ;;  %v867_v25 = vld [vmem:[#allocation2 + $0x38] sm:$0xff]  ;;  %v869_v26 = vld [vmem:[#allocation2 + $0xb0] sm:$0xff]  ;;  %v877_v30 = vld [vmem:[#allocation2 + $0x20] sm:$0xff] }
  0x15   :  { %113 = vadd.xlane.f32.xlu0 %v112_v10  ;;  %v871_v27 = vld [vmem:[#allocation2 + $0xb8] sm:$0xff]  ;;  %v76_v28 = vadd.f32 %v867_v25, %v865_v24  ;;  %v879_v31 = vld [vmem:[#allocation2 + $0x28] sm:$0xff]  ;;  %v881_v32 = vld [vmem:[#allocation2 + $0xa0] sm:$0xff] }
  0x16   :  { %110 = vadd.xlane.f32.xlu1 %v109_v11  ;;  %v100_v29 = vadd.f32 %v871_v27, %v869_v26  ;;  %v883_v33 = vld [vmem:[#allocation2 + $0xa8] sm:$0xff]  ;;  %v73_v34 = vadd.f32 %v879_v31, %v877_v30  ;;  %v889_v36 = vld [vmem:[#allocation2 + $0x10] sm:$0xff]  ;;  %v891_v37 = vld [vmem:[#allocation2 + $0x18] sm:$0xff] }
  0x17   :  { %v97_v35 = vadd.f32 %v883_v33, %v881_v32  ;;  %v894_v39 = vld [vmem:[#allocation2 + $0x90] sm:$0xff]  ;;  %v896_v40 = vld [vmem:[#allocation2 + $0x98] sm:$0xff]  ;;  %v70_v41 = vadd.f32 %v891_v37, %v889_v36  ;;  %v902_v43 = vld [vmem:[#allocation2] sm:$0xff] }
  0x18   :  { %v94_v42 = vadd.f32 %v896_v40, %v894_v39  ;;  %v904_v44 = vld [vmem:[#allocation2 + $0x8] sm:$0xff]  ;;  %v906_v45 = vld [vmem:[#allocation2 + $0x80] sm:$0xff] }
  0x19   :  { %83 = vadd.xlane.f32.xlu0 %v82_v16  ;;  %v908_v46 = vld [vmem:[#allocation2 + $0x88] sm:$0xff]  ;;  %v67_v47 = vadd.f32 %v904_v44, %v902_v43  ;;  %v133_v50 = vld [vmem:[%s1039_s2] sm:$0xf] }
  0x1a   :  { %107 = vadd.xlane.f32.xlu1 %v106_v17  ;;  %v91_v48 = vadd.f32 %v908_v46, %v906_v45 }
  0x1d   :  { %80 = vadd.xlane.f32.xlu0 %v79_v22 }
  0x1e   :  { %104 = vadd.xlane.f32.xlu1 %v103_v23 }
  0x21   :  { %77 = vadd.xlane.f32.xlu0 %v76_v28 }
  0x22   :  { %101 = vadd.xlane.f32.xlu1 %v100_v29 }
  0x25   :  { %74 = vadd.xlane.f32.xlu0 %v73_v34 }
  0x26   :  { %98 = vadd.xlane.f32.xlu1 %v97_v35 }
  0x29   :  { %71 = vadd.xlane.f32.xlu0 %v70_v41 }
  0x2a   :  { %95 = vadd.xlane.f32.xlu1 %v94_v42 }
  0x2d   :  { %68 = vadd.xlane.f32.xlu0 %v67_v47 }
  0x2e   :  { %92 = vadd.xlane.f32.xlu1 %v91_v48 }
  0x43   :  { %136 = vperm.xlu0 %683, %v133_v50  }
  0x9a   :  { %v90_v51 = vpop.xlane.xlu0 %89 }
  0x9b   :  { %v87_v52 = vpop.xlane.xlu1 %86 }
  0x9e   :  { %v114_v53 = vpop.xlane.xlu0 %113 }
  0x9f   :  { %v111_v54 = vpop.xlane.xlu1 %110  ;;  %v123_v55 = vsel %vm115_vm1, %v90_v51, %v114_v53  ;;  %v132_v53 = vld [vmem:[%s1038_s1] sm:$0xf] }
  0xa0   :  { %v122_v56 = vsel %vm115_vm1, %v87_v52, %v111_v54  ;;  %v131_v57 = vmul.f32 0.00390625, %v123_v55  ;;  %v214_v54 = vld [vmem:[%s1040_s3] sm:$0xff] }
  0xa1   :  { %v130_v58 = vmul.f32 0.00390625, %v122_v56  ;;  %663 = vmatprep.mubr.msk.f32.mxu1 %vm270_vm3, %v214_v54  ;;  %v222_v55 = vld [vmem:[%s1041_s4] sm:$0xff]  ;;  %v224_v56 = vld [vmem:[%s1041_s4 + $0x10] sm:$0xff] }
  0xa2   :  { %643 = vmatpush3.msra.mxu0 %v131_v57  ;;  %v84_v59 = vpop.xlane.xlu0 %83  ;;  %232 = vperm.xlu1 %684, %v222_v55   ;;  %v225_v57 = vld [vmem:[%s1041_s4 + $0x18] sm:$0xff] }
  0xa3   :  { %v108_v60 = vpop.xlane.xlu1 %107  ;;  %644 = vmatprep.subr.mxu0 %v776_v38 }
  0xa4   :  { %v121_v61 = vsel %vm115_vm1, %v84_v59, %v108_v60  ;;  %645 = vmatpush3.msra.mxu0 %v130_v58  ;;  %v226_v58 = vld [vmem:[%s1041_s4 + $0x20] sm:$0xff]  ;;  %v227_v59 = vld [vmem:[%s1041_s4 + $0x28] sm:$0xff]  ;;  %v228_v60 = vld [vmem:[%s1041_s4 + $0x30] sm:$0xff] }
  0xa5   :  { %v129_v62 = vmul.f32 0.00390625, %v121_v61  ;;  %646 = vmatprep.subr.mxu0 %v776_v38  ;;  %v229_v61 = vld [vmem:[%s1041_s4 + $0x38] sm:$0xff] }
  0xa6   :  { %v81_v63 = vpop.xlane.xlu0 %80 }
  0xa7   :  { %v105_v3 = vpop.xlane.xlu1 %104  ;;  %647 = vmatpush3.msra.mxu0 %v129_v62 }
  0xa8   :  { %v120_v7 = vsel %vm115_vm1, %v81_v63, %v105_v3  ;;  %648 = vmatprep.subr.mxu0 %v776_v38 }
  0xa9   :  { %v128_v10 = vmul.f32 0.00390625, %v120_v7 }
  0xaa   :  { %v78_v11 = vpop.xlane.xlu0 %77 }
  0xab   :  { %v102_v16 = vpop.xlane.xlu1 %101  ;;  %649 = vmatpush3.msra.mxu0 %v128_v10 }
  0xac   :  { %v119_v17 = vsel %vm115_vm1, %v78_v11, %v102_v16  ;;  %650 = vmatprep.subr.mxu0 %v776_v38  ;;  %v215_v11 = vld [vmem:[%s1040_s3 + $0x8] sm:$0xff]  ;;  %v216_v16 = vld [vmem:[%s1040_s3 + $0x10] sm:$0xff] }
  0xad   :  { %v127_v22 = vmul.f32 0.00390625, %v119_v17  ;;  %v217_v17 = vld [vmem:[%s1040_s3 + $0x18] sm:$0xff] }
  0xae   :  { %v75_v23 = vpop.xlane.xlu0 %74 }
  0xaf   :  { %v99_v28 = vpop.xlane.xlu1 %98  ;;  %651 = vmatpush3.msra.mxu0 %v127_v22  ;;  %v218_v22 = vld [vmem:[%s1040_s3 + $0x20] sm:$0xff] }
  0xb0   :  { %v118_v29 = vsel %vm115_vm1, %v75_v23, %v99_v28  ;;  %652 = vmatprep.subr.mxu0 %v776_v38  ;;  %v219_v23 = vld [vmem:[%s1040_s3 + $0x28] sm:$0xff]  ;;  %v220_v28 = vld [vmem:[%s1040_s3 + $0x30] sm:$0xff] }
  0xb1   :  { %v126_v34 = vmul.f32 0.00390625, %v118_v29  ;;  %v221_v29 = vld [vmem:[%s1040_s3 + $0x38] sm:$0xff]  ;;  %s780_s3 = smov [#allocation5]  }
  0xb2   :  { %v72_v35 = vpop.xlane.xlu0 %71  ;;  %s594_s7 = sshll.u32 %s780_s3, 4  ;;  %s595_s7 = int_to_ptr.vmem [resolvable:$true] %s594_s7 }
  0xb3   :  { %v96_v41 = vpop.xlane.xlu1 %95  ;;  %653 = vmatpush3.msra.mxu0 %v126_v34  ;;  %s749_s1 = scalar_lea.vmem %s595_s7, 4096  ;;  %p754_p6 = scmp.lt.s32.totalorder %s595_s7, %s595_s7 }
  0xb4   :  { %v117_v42 = vsel %vm115_vm1, %v72_v35, %v96_v41  ;;  %654 = vmatprep.subr.mxu0 %v776_v38  ;;  %p750_p5 = scmp.ne.s32.totalorder %s595_s7, %s749_s1  ;;  %p755_p7 = scmp.lt.s32.totalorder %s749_s1, %s749_s1 }
  0xb5   :  { %v125_v47 = vmul.f32 0.00390625, %v117_v42 }
  0xb6   :  { %v69_v48 = vpop.xlane.xlu0 %68  ;;  %p756_p8 = por %p755_p7, %p754_p6 }
  0xb7   :  { %v93_v50 = vpop.xlane.xlu1 %92  ;;  %655 = vmatpush3.msra.mxu0 %v125_v47 }
  0xb8   :  { %v116_v51 = vsel %vm115_vm1, %v69_v48, %v93_v50  ;;  %656 = vmatprep.subr.mxu0 %v776_v38  ;;  %v223_v38 = vld [vmem:[%s1041_s4 + $0x8] sm:$0xff]  ;;  %p757_p9 = pnand %p756_p8, %p750_p5 }
  0xb9   :  { %v124_v52 = vmul.f32 0.00390625, %v116_v51  ;;  %237 = vperm.xlu1 %684, %v223_v38  }
  0xbb   :  { %657 = vmatpush3.msra.mxu0 %v124_v52 }
  0xbc   :  { %659 = vmatmul.mubr.msk.f32.vlgmr.msra.gmra.mxu0 %vm139_vm2, %v132_v53 }
  0xbd   :  { %242 = vperm.xlu1 %684, %v224_v56  }
  0xbe   :  { %v137_v62 = vpop.permute.xlu0 %136 }
  0xc1   :  { %247 = vperm.xlu1 %684, %v225_v57  }
  0xc5   :  { %252 = vperm.xlu1 %684, %v226_v58  }
  0xc9   :  { %257 = vperm.xlu1 %684, %v227_v59  }
  0xcd   :  { %262 = vperm.xlu1 %684, %v228_v60  }
  0xd1   :  { %267 = vperm.xlu1 %684, %v229_v61  }
 0x11d   :  { %v233_v34 = vpop.permute.xlu1 %232 }
 0x134   :  { %v238_v35 = vpop.permute.xlu1 %237 }
 0x138   :  { %v243_v41 = vpop.permute.xlu1 %242 }
 0x13c   :  { %v248_v42 = vpop.permute.xlu1 %247 }
 0x140   :  { %v253_v50 = vpop.permute.xlu1 %252 }
 0x144   :  { %v258_v58 = vpop.permute.xlu1 %257 }
 0x17c   :  { %v209_v63 = vpop.f32.mrf.mxu0 }
 0x17d   :  { %v210_v3 = vadd.f32 %v209_v63, %v137_v62 }
 0x17e   :  { %v660_v7 = vpop.f32.mrf.mxu0 }
 0x17f   :  { %v213_v10 = vmax.f32 %v210_v3, 0.0  ;;  %v263_v3 = vpop.permute.xlu1 %262 }
 0x181   :  { %661 = vmatprep.subr.msk.mxu1 %vm295_vm4, %v213_v10 }
 0x182   :  { %662 = vmatpush3.msk.msra.mxu1 %vm295_vm4, %v213_v10 }
 0x183   :  { %664 = vmatmul.mubr.msk.f32.vlgmr.msra.gmra.mxu1 %vm270_vm3, %v215_v11 }
 0x184   :  { %666 = vmatprep.mubr.msk.f32.mxu1 %vm270_vm3, %v216_v16 }
 0x187   :  { %667 = vmatmul.mubr.msk.f32.gmra.mxu1 %vm270_vm3, %v217_v17 }
 0x188   :  { %669 = vmatprep.mubr.msk.f32.mxu1 %vm270_vm3, %v218_v22 }
 0x18b   :  { %670 = vmatmul.mubr.msk.f32.gmra.mxu1 %vm270_vm3, %v219_v23 }
 0x18c   :  { %672 = vmatprep.mubr.msk.f32.mxu1 %vm270_vm3, %v220_v28  ;;  %v268_v28 = vpop.permute.xlu1 %267 }
 0x18f   :  { %673 = vmatmul.mubr.msk.f32.gmra.mxu1 %vm270_vm3, %v221_v29 }
 0x243   :  { %v665_v47 = vpop.f32.mrf.mxu1 }
 0x244   :  { %v371_v48 = vadd.f32 %v665_v47, %v238_v35 }
 0x245   :  { %v365_v51 = vpop.f32.mrf.mxu1 }
 0x246   :  { %v617_v52 = vmul.f32 -1.442695, %v371_v48  ;;  %v366_v53 = vadd.f32 %v365_v51, %v233_v34 }
 0x247   :  { %v668_v54 = vpop.f32.mrf.mxu1 }
 0x248   :  { %697 = vpow2.f32 %v617_v52  ;;  %v616_v55 = vmul.f32 -1.442695, %v366_v53  ;;  %v381_v38 = vadd.f32 %v668_v54, %v248_v42 }
 0x249   :  { %v375_v56 = vpop.f32.mrf.mxu1 }
 0x24a   :  { %699 = vpow2.f32 %v616_v55  ;;  %v619_v57 = vmul.f32 -1.442695, %v381_v38  ;;  %v376_v59 = vadd.f32 %v375_v56, %v243_v41 }
 0x24b   :  { %v671_v60 = vpop.f32.mrf.mxu1 }
 0x24c   :  { %701 = vpow2.f32 %v619_v57  ;;  %v618_v62 = vmul.f32 -1.442695, %v376_v59  ;;  %v391_v63 = vadd.f32 %v671_v60, %v258_v58  ;;  %v779_v57 = vmov 1  }
 0x24d   :  { %v385_v61 = vpop.f32.mrf.mxu1 }
 0x24e   :  { %703 = vpow2.f32 %v618_v62  ;;  %v621_v10 = vmul.f32 -1.442695, %v391_v63  ;;  %v386_v16 = vadd.f32 %v385_v61, %v253_v50 }
 0x24f   :  { %v674_v7 = vpop.f32.mrf.mxu1 }
 0x250   :  { %705 = vpow2.f32 %v621_v10  ;;  %v401_v34 = vadd.f32 %v674_v7, %v268_v28  ;;  %v620_v35 = vmul.f32 -1.442695, %v386_v16 }
 0x251   :  { %v395_v22 = vpop.f32.mrf.mxu1 }
 0x252   :  { %v396_v41 = vadd.f32 %v395_v22, %v263_v3  ;;  %v623_v47 = vmul.f32 -1.442695, %v401_v34 }
 0x254   :  { %v622_v48 = vmul.f32 -1.442695, %v396_v41 }
 0x255   :  { %v698_v11 = vpop.eup %697 }
 0x256   :  { %v429_v17 = vadd.f32 1.0, %v698_v11 }
 0x257   :  { %v700_v23 = vpop.eup %699 }
 0x258   :  { %707 = vrcp.f32 %v429_v17  ;;  %v428_v29 = vadd.f32 1.0, %v700_v23 }
 0x259   :  { %v702_v42 = vpop.eup %701 }
 0x25a   :  { %709 = vrcp.f32 %v428_v29  ;;  %v431_v51 = vadd.f32 1.0, %v702_v42 }
 0x25b   :  { %711 = vpow2.f32 %v620_v35  ;;  %v704_v52 = vpop.eup %703 }
 0x25c   :  { %713 = vpow2.f32 %v623_v47  ;;  %v430_v50 = vadd.f32 1.0, %v704_v52 }
 0x25d   :  { %715 = vpow2.f32 %v622_v48  ;;  %v706_v53 = vpop.eup %705 }
 0x25e   :  { %717 = vrcp.f32 %v431_v51  ;;  %v433_v38 = vadd.f32 1.0, %v706_v53 }
 0x25f   :  { %719 = vrcp.f32 %v430_v50 }
 0x260   :  { %721 = vrcp.f32 %v433_v38 }
 0x265   :  { %v708_v54 = vpop.eup %707 }
 0x266   :  { %459 = vperm.xlu1 %684, %v708_v54  }
 0x267   :  { %v710_v55 = vpop.eup %709 }
 0x268   :  { %454 = vperm.xlu0 %683, %v710_v55   ;;  %v712_v56 = vpop.eup %711 }
 0x269   :  { %v714_v58 = vpop.eup %713  ;;  %v432_v59 = vadd.f32 1.0, %v712_v56 }
 0x26a   :  { %685 = vset.pattern.permute.xlu1 %v779_v57  ;;  %v716_v60 = vpop.eup %715  ;;  %v435_v62 = vadd.f32 1.0, %v714_v58 }
 0x26b   :  { %529 = vperm.xlu1 %685, %v708_v54   ;;  %v718_v61 = vpop.eup %717  ;;  %723 = vrcp.f32 %v432_v59  ;;  %v434_v63 = vadd.f32 1.0, %v716_v60 }
 0x26c   :  { %686 = vset.pattern.permute.xlu0 %v779_v57  ;;  %v720_v3 = vpop.eup %719  ;;  %725 = vrcp.f32 %v435_v62 }
 0x26d   :  { %525 = vperm.xlu0 %686, %v710_v55   ;;  %727 = vrcp.f32 %v434_v63  ;;  %v722_v7 = vpop.eup %721 }
 0x26f   :  { %687 = vset.pattern.permute.xlu1 %v778_v49 }
 0x270   :  { %469 = vperm.xlu1 %687, %v718_v61  }
 0x271   :  { %537 = vperm.xlu0 %686, %v718_v61  }
 0x274   :  { %689 = vset.pattern.permute.xlu1 %v779_v57 }
 0x275   :  { %533 = vperm.xlu1 %689, %v720_v3   ;;  %688 = vset.pattern.permute.xlu0 %v778_v49 }
 0x276   :  { %464 = vperm.xlu0 %688, %v720_v3  }
 0x278   :  { %v724_v10 = vpop.eup %723 }
 0x279   :  { %690 = vset.pattern.permute.xlu1 %v778_v49  ;;  %v726_v11 = vpop.eup %725 }
 0x27a   :  { %479 = vperm.xlu1 %690, %v722_v7   ;;  %691 = vset.pattern.permute.xlu0 %v779_v57  ;;  %v728_v16 = vpop.eup %727 }
 0x27b   :  { %545 = vperm.xlu0 %691, %v722_v7  }
 0x27e   :  { %693 = vset.pattern.permute.xlu1 %v779_v57 }
 0x27f   :  { %541 = vperm.xlu1 %693, %v724_v10   ;;  %692 = vset.pattern.permute.xlu0 %v778_v49 }
 0x280   :  { %474 = vperm.xlu0 %692, %v724_v10  }
 0x283   :  { %694 = vset.pattern.permute.xlu1 %v778_v49 }
 0x284   :  { %489 = vperm.xlu1 %694, %v726_v11   ;;  %484 = vperm.xlu0 %692, %v728_v16  }
 0x288   :  { %695 = vset.pattern.permute.xlu1 %v779_v57  ;;  %696 = vset.pattern.permute.xlu0 %v779_v57 }
 0x289   :  { %549 = vperm.xlu1 %695, %v728_v16   ;;  %553 = vperm.xlu0 %696, %v726_v11  }
 0x2e1   :  { %v460_v17 = vpop.permute.xlu1 %459 }
 0x2e2   :  { %v494_v22 = vmul.f32 %v460_v17, %v889_v36  ;;  %v495_v23 = vmul.f32 %v460_v17, %v891_v37 }
 0x2e3   :  { %v455_v28 = vpop.permute.xlu0 %454 }
 0x2e4   :  { %510 = vst [vmem:[#allocation5 + $0x10] sm:$0xff] %v494_v22  ;;  %511 = vst [vmem:[#allocation5 + $0x18] sm:$0xff] %v495_v23  ;;  %v492_v29 = vmul.f32 %v455_v28, %v902_v43  ;;  %v493_v34 = vmul.f32 %v455_v28, %v904_v44 }
 0x2e6   :  { %508 = vst [vmem:[#allocation5] sm:$0xff] %v492_v29  ;;  %509 = vst [vmem:[#allocation5 + $0x8] sm:$0xff] %v493_v34  ;;  %v530_v49 = vpop.permute.xlu1 %529 }
 0x2e7   :  { %v558_v35 = vmul.f32 %v530_v49, %v894_v39  ;;  %v559_v41 = vmul.f32 %v530_v49, %v896_v40 }
 0x2e8   :  { %v526_v42 = vpop.permute.xlu0 %525 }
 0x2e9   :  { %575 = vst [vmem:[#allocation5 + $0x90] sm:$0xff] %v558_v35  ;;  %576 = vst [vmem:[#allocation5 + $0x98] sm:$0xff] %v559_v41  ;;  %v556_v36 = vmul.f32 %v526_v42, %v906_v45  ;;  %v557_v37 = vmul.f32 %v526_v42, %v908_v46 }
 0x2eb   :  { %573 = vst [vmem:[#allocation5 + $0x80] sm:$0xff] %v556_v36  ;;  %574 = vst [vmem:[#allocation5 + $0x88] sm:$0xff] %v557_v37  ;;  %v470_v47 = vpop.permute.xlu1 %469 }
 0x2ec   :  { %v498_v43 = vmul.f32 %v470_v47, %v865_v24  ;;  %v499_v44 = vmul.f32 %v470_v47, %v867_v25  ;;  %v538_v48 = vpop.permute.xlu0 %537 }
 0x2ed   :  { %v562_v51 = vmul.f32 %v538_v48, %v869_v26  ;;  %v563_v39 = vmul.f32 %v538_v48, %v871_v27 }
 0x2ee   :  { %514 = vst [vmem:[#allocation5 + $0x30] sm:$0xff] %v498_v43  ;;  %515 = vst [vmem:[#allocation5 + $0x38] sm:$0xff] %v499_v44 }
 0x2ef   :  { %579 = vst [vmem:[#allocation5 + $0xb0] sm:$0xff] %v562_v51  ;;  %580 = vst [vmem:[#allocation5 + $0xb8] sm:$0xff] %v563_v39 }
 0x2f0   :  { %v534_v40 = vpop.permute.xlu1 %533 }
 0x2f1   :  { %v560_v45 = vmul.f32 %v534_v40, %v881_v32  ;;  %v561_v46 = vmul.f32 %v534_v40, %v883_v33  ;;  %v465_v52 = vpop.permute.xlu0 %464 }
 0x2f2   :  { %v496_v50 = vmul.f32 %v465_v52, %v877_v30  ;;  %v497_v24 = vmul.f32 %v465_v52, %v879_v31 }
 0x2f3   :  { %577 = vst [vmem:[#allocation5 + $0xa0] sm:$0xff] %v560_v45  ;;  %578 = vst [vmem:[#allocation5 + $0xa8] sm:$0xff] %v561_v46 }
 0x2f4   :  { %512 = vst [vmem:[#allocation5 + $0x20] sm:$0xff] %v496_v50  ;;  %513 = vst [vmem:[#allocation5 + $0x28] sm:$0xff] %v497_v24 }
 0x2f5   :  { %v480_v25 = vpop.permute.xlu1 %479 }
 0x2f6   :  { %v502_v26 = vmul.f32 %v480_v25, %v841_v12  ;;  %v503_v27 = vmul.f32 %v480_v25, %v843_v13  ;;  %v546_v53 = vpop.permute.xlu0 %545 }
 0x2f7   :  { %v566_v54 = vmul.f32 %v546_v53, %v845_v14  ;;  %v567_v32 = vmul.f32 %v546_v53, %v847_v15 }
 0x2f8   :  { %518 = vst [vmem:[#allocation5 + $0x50] sm:$0xff] %v502_v26  ;;  %519 = vst [vmem:[#allocation5 + $0x58] sm:$0xff] %v503_v27 }
 0x2f9   :  { %583 = vst [vmem:[#allocation5 + $0xd0] sm:$0xff] %v566_v54  ;;  %584 = vst [vmem:[#allocation5 + $0xd8] sm:$0xff] %v567_v32 }
 0x2fa   :  { %v542_v30 = vpop.permute.xlu1 %541 }
 0x2fb   :  { %v564_v31 = vmul.f32 %v542_v30, %v857_v20  ;;  %v565_v33 = vmul.f32 %v542_v30, %v859_v21  ;;  %v475_v55 = vpop.permute.xlu0 %474 }
 0x2fc   :  { %v500_v38 = vmul.f32 %v475_v55, %v853_v18  ;;  %v501_v12 = vmul.f32 %v475_v55, %v855_v19 }
 0x2fd   :  { %581 = vst [vmem:[#allocation5 + $0xc0] sm:$0xff] %v564_v31  ;;  %582 = vst [vmem:[#allocation5 + $0xc8] sm:$0xff] %v565_v33 }
 0x2fe   :  { %516 = vst [vmem:[#allocation5 + $0x40] sm:$0xff] %v500_v38  ;;  %517 = vst [vmem:[#allocation5 + $0x48] sm:$0xff] %v501_v12 }
 0x2ff   :  { %v490_v13 = vpop.permute.xlu1 %489  ;;  %v485_v14 = vpop.permute.xlu0 %484 }
 0x300   :  { %v506_v15 = vmul.f32 %v490_v13, %v817_v0  ;;  %v507_v56 = vmul.f32 %v490_v13, %v819_v1  ;;  %v504_v57 = vmul.f32 %v485_v14, %v821_v2  ;;  %v505_v20 = vmul.f32 %v485_v14, %v825_v4 }
 0x302   :  { %522 = vst [vmem:[#allocation5 + $0x70] sm:$0xff] %v506_v15  ;;  %523 = vst [vmem:[#allocation5 + $0x78] sm:$0xff] %v507_v56 }
 0x303   :  { %520 = vst [vmem:[#allocation5 + $0x60] sm:$0xff] %v504_v57  ;;  %521 = vst [vmem:[#allocation5 + $0x68] sm:$0xff] %v505_v20 }
 0x304   :  { %v550_v18 = vpop.permute.xlu1 %549  ;;  %v554_v19 = vpop.permute.xlu0 %553 }
 0x305   :  { %v568_v21 = vmul.f32 %v550_v18, %v833_v8  ;;  %v569_v58 = vmul.f32 %v550_v18, %v835_v9  ;;  %v570_v0 = vmul.f32 %v554_v19, %v827_v5  ;;  %v571_v1 = vmul.f32 %v554_v19, %v829_v6 }
 0x307   :  { %585 = vst [vmem:[#allocation5 + $0xe0] sm:$0xff] %v568_v21  ;;  %586 = vst [vmem:[#allocation5 + $0xe8] sm:$0xff] %v569_v58 }
 0x308   :  { %587 = vst [vmem:[#allocation5 + $0xf0] sm:$0xff] %v570_v0  ;;  %588 = vst [vmem:[#allocation5 + $0xf8] sm:$0xff] %v571_v1 }
 0x309   :  { %760 = shalt.err (!%p757_p9)
}
 0x30a   :  { %600 = dma.vmem_to_hbm [thread:$0]  %s595_s7, 4096, %s1042_s5, [#allocation4], %s774_s21, %s774_s21, %s775_s22  }
 0x30b   :  { %771 = dma.done.wait [#allocation4], 4096  }
 0x30c   :  { %772 = vsyncadd [#allocation4], 4294963200 }
 0x30d   :  { %604 = vsyncpa [#allocation3], 1 }
 0x30e   :  { %605 = vsyncpa [#allocation4], 1 }

</bundles_post_ra>
